<compile_context>
chip_gen: v6e
topology: v6e:2x2x1
jax: 0.10.0
libtpu: 0.0.40
codegen_flags: <defaults>
</compile_context>

<pallas_src>
import functools

import jax
import jax.numpy as jnp
from jax.experimental import pallas as pl
from jax.experimental.pallas import tpu as pltpu

LN_EPS = 1e-5  # nn.LayerNorm default
_MiB = 1024 * 1024


def _round_up(a, b):
    return pl.cdiv(a, b) * b


def _vmem_capacity_bytes():
    """Physical per-TensorCore VMEM; conservative fallback if unavailable."""
    try:
        info = pltpu.get_tpu_info()
        for attr in ("vmem_capacity_bytes", "vmem_size_bytes", "vmem_bytes"):
            v = getattr(info, attr, None)
            if v:
                return int(v)
    except Exception:
        pass
    return 64 * _MiB  # v7x per-TC size: safe lower bound everywhere


def _pick_config(M, Dp, x_itemsize, out_itemsize):
    """Choose (tile_rows, tn, vmem_limit) so the VMEM footprint fits the chip."""
    cap = _vmem_capacity_bytes()
    vmem_limit = min(cap - 16 * _MiB, 100 * _MiB)   # headroom for Mosaic scratch
    budget = vmem_limit - 4 * _MiB

    w_full = Dp * Dp * 2                            # bf16 weight, single buffer
    if w_full <= budget // 2:
        tn = Dp                                     # weight fully resident
        w_cost = w_full
    else:                                           # v7x / very large D: N-tile W
        tn = next(t for t in (1024, 512, 256, 128) if Dp % t == 0)
        w_cost = 2 * Dp * tn * 2                    # double-buffered weight tiles

    tile_rows = 512 if vmem_limit >= 96 * _MiB else 256

    def footprint(tr):
        return (w_cost
                + 2 * tr * Dp * x_itemsize          # x tile, double-buffered
                + 2 * tr * tn * out_itemsize        # out tile, double-buffered
                + tr * Dp * 2                       # bf16 LN scratch
                + 8 * Dp * 4)                       # gamma/beta/bias

    while tile_rows > 64 and footprint(tile_rows) > budget:
        tile_rows //= 2

    # Don't over-tile tiny inputs, and keep >= 2 row tiles when possible so the
    # "parallel" row axis can shard across both v7x TensorCores.
    tile_rows = min(tile_rows, _round_up(M, 8))
    if M > 8:
        tile_rows = min(tile_rows, _round_up(pl.cdiv(M, 2), 8))
    tile_rows = max(tile_rows, 8)
    return tile_rows, tn, vmem_limit


def sublayer_connection_kernel(x_ref, gamma_ref, beta_ref, w_ref, b_ref, o_ref,
                               y_ref, *, d_true, tn):
    # grid = (row tiles, output-column tiles of W); j indexes the column tile.
    j = pl.program_id(1)

    # LayerNorm once per row tile (j == 0); stash the bf16 MXU input in VMEM.
    @pl.when(j == 0)
    def _():
        x = x_ref[...].astype(jnp.float32)
        inv_d = 1.0 / d_true
        # Single-pass stats over the true hidden size: padded lanes of x are
        # zero so the raw sums are already correct.
        s1 = jnp.sum(x, axis=-1, keepdims=True)
        s2 = jnp.sum(x * x, axis=-1, keepdims=True)
        mean = s1 * inv_d
        var = jnp.maximum(s2 * inv_d - mean * mean, 0.0)
        xhat = (x - mean) * jax.lax.rsqrt(var + LN_EPS)
        # gamma/beta padded lanes are zero -> y padded lanes are exactly zero.
        y_ref[...] = (xhat * gamma_ref[...] + beta_ref[...]).astype(jnp.bfloat16)

    # sublayer: Linear(size, size) on the MXU (bf16 inputs, f32 accumulation).
    sub = jnp.dot(y_ref[...], w_ref[...], preferred_element_type=jnp.float32)
    sub = sub + b_ref[...]

    # residual add on the matching columns of x, in f32.
    col = pl.multiple_of(j * tn, 128)
    x_cols = x_ref[:, pl.ds(col, tn)].astype(jnp.float32)
    o_ref[...] = (x_cols + sub).astype(o_ref.dtype)


def sublayer_connection(x, gamma, beta, w, b):
    """x: (B, S, D). Returns x + Linear(LayerNorm(x)), like SublayerConnection."""
    B, S, D = x.shape
    M = B * S
    Dp = max(128, _round_up(D, 128))          # lane-dense hidden dim

    x_itemsize = jnp.dtype(x.dtype).itemsize
    tile_rows, tn, vmem_limit = _pick_config(M, Dp, x_itemsize, x_itemsize)

    # No row padding: grid uses cdiv(M, tile_rows) and Pallas masks the partial
    # last block.  Lane padding (and the matching output slice) only when
    # D % 128 != 0 — for real transformer widths this path is skipped entirely.
    x2 = x.reshape(M, D)
    if Dp != D:
        x2 = jnp.pad(x2, ((0, 0), (0, Dp - D)))
        gamma_p = jnp.pad(gamma.reshape(1, D).astype(jnp.float32), ((0, 0), (0, Dp - D)))
        beta_p = jnp.pad(beta.reshape(1, D).astype(jnp.float32), ((0, 0), (0, Dp - D)))
        w_p = jnp.pad(w.astype(jnp.bfloat16), ((0, Dp - D), (0, Dp - D)))
        b_p = jnp.pad(b.reshape(1, D).astype(jnp.float32), ((0, 0), (0, Dp - D)))
    else:
        gamma_p = gamma.reshape(1, D).astype(jnp.float32)
        beta_p = beta.reshape(1, D).astype(jnp.float32)
        w_p = w.astype(jnp.bfloat16)
        b_p = b.reshape(1, D).astype(jnp.float32)

    resident_w = tn == Dp
    single = pl.Buffered(1)   # grid-invariant operands: don't double-buffer

    w_spec = (pl.BlockSpec((Dp, Dp), lambda i, j: (0, 0), pipeline_mode=single)
              if resident_w else
              pl.BlockSpec((Dp, tn), lambda i, j: (0, j)))
    b_spec = (pl.BlockSpec((1, Dp), lambda i, j: (0, 0), pipeline_mode=single)
              if resident_w else
              pl.BlockSpec((1, tn), lambda i, j: (0, j)))

    kernel = functools.partial(sublayer_connection_kernel, d_true=D, tn=tn)

    grid = (pl.cdiv(M, tile_rows), Dp // tn)
    cost = pl.CostEstimate(
        flops=2 * M * Dp * Dp,
        transcendentals=M,
        bytes_accessed=2 * M * Dp * x_itemsize + Dp * Dp * 2 + 3 * Dp * 4,
    )

    out = pl.pallas_call(
        kernel,
        out_shape=jax.ShapeDtypeStruct((M, Dp), x.dtype),
        grid_spec=pltpu.PrefetchScalarGridSpec(
            num_scalar_prefetch=0,
            grid=grid,
            in_specs=[
                pl.BlockSpec((tile_rows, Dp), lambda i, j: (i, 0)),   # x tile
                pl.BlockSpec((1, Dp), lambda i, j: (0, 0), pipeline_mode=single),  # gamma
                pl.BlockSpec((1, Dp), lambda i, j: (0, 0), pipeline_mode=single),  # beta
                w_spec,                                               # W (bf16)
                b_spec,                                               # bias
            ],
            out_specs=pl.BlockSpec((tile_rows, tn), lambda i, j: (i, j)),
            scratch_shapes=[pltpu.VMEM((tile_rows, Dp), jnp.bfloat16)],
        ),
        compiler_params=pltpu.CompilerParams(
            dimension_semantics=("parallel", "arbitrary"),
            vmem_limit_bytes=int(vmem_limit),
        ),
        cost_estimate=cost,
    )(x2, gamma_p, beta_p, w_p, b_p)

    if Dp != D:
        out = out[:, :D]
    return out.reshape(B, S, D)


def reference(x, gamma, beta, w, b):
    # Matches the kernel's compute recipe (f32 LayerNorm, bf16 MXU inputs,
    # f32 accumulation, f32 residual) — bf16 matmul is intentional precision
    # policy, covered by the 1e-2 tolerance.
    xf = x.astype(jnp.float32)
    mean = xf.mean(-1, keepdims=True)
    var = ((xf - mean) ** 2).mean(-1, keepdims=True)
    xhat = (xf - mean) * jax.lax.rsqrt(var + LN_EPS)
    y = xhat * gamma.reshape(1, 1, -1) + beta.reshape(1, 1, -1)
    sub = jnp.dot(y.astype(jnp.bfloat16), w.astype(jnp.bfloat16),
                  preferred_element_type=jnp.float32)
    sub = sub + b.reshape(1, 1, -1)
    return (xf + sub).astype(x.dtype)


if __name__ == "__main__":
    key = jax.random.PRNGKey(0)
    B, S, D = 2, 8, 32
    kx, kw, kb = jax.random.split(key, 3)

    x = jax.random.normal(kx, (B, S, D), dtype=jnp.float32)

    # Deterministic synthetic parameters (not a checkpoint load):
    # LayerNorm affine: gamma=1, beta=0 (PyTorch default init).
    gamma = jnp.ones((1, D), dtype=jnp.float32)
    beta = jnp.zeros((1, D), dtype=jnp.float32)
    # Sublayer Linear(size, size) weights, deterministic from PRNGKey(0).
    w = jax.random.normal(kw, (D, D), dtype=jnp.float32) * (1.0 / jnp.sqrt(D))
    b = jax.random.normal(kb, (1, D), dtype=jnp.float32) * 0.02

    out = sublayer_connection(x, gamma, beta, w, b)
    jax.block_until_ready(out)

    ref = reference(x, gamma, beta, w, b)
    assert out.shape == (B, S, D)
    assert jnp.allclose(out, ref, atol=1e-2, rtol=1e-2), "mismatch vs reference"

    print("KERNEL_OK")
</pallas_src>

<mosaic_0001>
module attributes {stable_mosaic.version = 11 : i64} {
  func.func @sublayer_connection_kernel(%arg0: i32, %arg1: i32, %arg2: memref<8x128xf32, #tpu.memory_space<vmem>>, %arg3: memref<1x128xf32, #tpu.memory_space<vmem>>, %arg4: memref<1x128xf32, #tpu.memory_space<vmem>>, %arg5: memref<128x128xbf16, #tpu.memory_space<vmem>>, %arg6: memref<1x128xf32, #tpu.memory_space<vmem>>, %arg7: memref<8x128xf32, #tpu.memory_space<vmem>>, %arg8: memref<8x128xbf16, #tpu.memory_space<vmem>>) attributes {dimension_semantics = [#tpu.dimension_semantics<parallel>, #tpu.dimension_semantics<arbitrary>], iteration_bounds = array<i64: 2, 1>, scalar_prefetch = 0 : i64, scratch_operands = 1 : i64, tpu.core_type = #tpu.core_type<tc>, window_params = [{transform_indices = @transform_0, window_bounds = array<i64: 8, 128>}, {pipeline_mode = #tpu.pipeline_mode<synchronous>, transform_indices = @transform_1, window_bounds = array<i64: 1, 128>}, {pipeline_mode = #tpu.pipeline_mode<synchronous>, transform_indices = @transform_2, window_bounds = array<i64: 1, 128>}, {pipeline_mode = #tpu.pipeline_mode<synchronous>, transform_indices = @transform_3, window_bounds = array<i64: 128, 128>}, {pipeline_mode = #tpu.pipeline_mode<synchronous>, transform_indices = @transform_4, window_bounds = array<i64: 1, 128>}, {transform_indices = @transform_5, window_bounds = array<i64: 8, 128>}]} {
    %c0_i32 = arith.constant 0 : i32
    %0 = arith.cmpi eq, %arg1, %c0_i32 : i32
    %1 = arith.extui %0 : i1 to i32
    %c0_i32_0 = arith.constant 0 : i32
    %2 = arith.cmpi ne, %1, %c0_i32_0 : i32
    scf.if %2 {
      %c0_9 = arith.constant 0 : index
      %c0_10 = arith.constant 0 : index
      %15 = vector.load %arg2[%c0_9, %c0_10] : memref<8x128xf32, #tpu.memory_space<vmem>>, vector<8x128xf32>
      %cst_11 = arith.constant dense<0.000000e+00> : vector<8xf32>
      %16 = vector.multi_reduction <add>, %15, %cst_11 [1] : vector<8x128xf32> to vector<8xf32>
      %17 = vector.shape_cast %16 : vector<8xf32> to vector<8x1xf32>
      %18 = arith.mulf %15, %15 : vector<8x128xf32>
      %cst_12 = arith.constant dense<0.000000e+00> : vector<8xf32>
      %19 = vector.multi_reduction <add>, %18, %cst_12 [1] : vector<8x128xf32> to vector<8xf32>
      %20 = vector.shape_cast %19 : vector<8xf32> to vector<8x1xf32>
      %cst_13 = arith.constant 3.125000e-02 : f32
      %21 = vector.broadcast %cst_13 : f32 to vector<8x1xf32>
      %22 = arith.mulf %17, %21 : vector<8x1xf32>
      %cst_14 = arith.constant 3.125000e-02 : f32
      %23 = vector.broadcast %cst_14 : f32 to vector<8x1xf32>
      %24 = arith.mulf %20, %23 : vector<8x1xf32>
      %25 = arith.mulf %22, %22 : vector<8x1xf32>
      %26 = arith.subf %24, %25 : vector<8x1xf32>
      %cst_15 = arith.constant 0.000000e+00 : f32
      %27 = vector.broadcast %cst_15 : f32 to vector<8x1xf32>
      %28 = arith.maximumf %26, %27 : vector<8x1xf32>
      %29 = vector.broadcast %22 : vector<8x1xf32> to vector<8x128xf32>
      %30 = arith.subf %15, %29 : vector<8x128xf32>
      %cst_16 = arith.constant 9.99999974E-6 : f32
      %31 = vector.broadcast %cst_16 : f32 to vector<8x1xf32>
      %32 = arith.addf %28, %31 : vector<8x1xf32>
      %33 = math.rsqrt %32 : vector<8x1xf32>
      %34 = vector.broadcast %33 : vector<8x1xf32> to vector<8x128xf32>
      %35 = arith.mulf %30, %34 : vector<8x128xf32>
      %c0_17 = arith.constant 0 : index
      %c0_18 = arith.constant 0 : index
      %36 = vector.load %arg3[%c0_17, %c0_18] : memref<1x128xf32, #tpu.memory_space<vmem>>, vector<1x128xf32>
      %37 = vector.broadcast %36 : vector<1x128xf32> to vector<8x128xf32>
      %38 = arith.mulf %35, %37 : vector<8x128xf32>
      %c0_19 = arith.constant 0 : index
      %c0_20 = arith.constant 0 : index
      %39 = vector.load %arg4[%c0_19, %c0_20] : memref<1x128xf32, #tpu.memory_space<vmem>>, vector<1x128xf32>
      %40 = vector.broadcast %39 : vector<1x128xf32> to vector<8x128xf32>
      %41 = arith.addf %38, %40 : vector<8x128xf32>
      %42 = arith.truncf %41 : vector<8x128xf32> to vector<8x128xbf16>
      %c0_21 = arith.constant 0 : index
      %c0_22 = arith.constant 0 : index
      %43 = vector.load %arg8[%c0_21, %c0_22] : memref<8x128xbf16, #tpu.memory_space<vmem>>, vector<8x128xbf16>
      tpu.vector_store %arg8[%c0_21, %c0_22], %42 {strides = array<i32>} : memref<8x128xbf16, #tpu.memory_space<vmem>>, vector<8x128xbf16>,
    } else {
    }
    %c0 = arith.constant 0 : index
    %c0_1 = arith.constant 0 : index
    %3 = vector.load %arg8[%c0, %c0_1] : memref<8x128xbf16, #tpu.memory_space<vmem>>, vector<8x128xbf16>
    %c0_2 = arith.constant 0 : index
    %c0_3 = arith.constant 0 : index
    %4 = vector.load %arg5[%c0_2, %c0_3] : memref<128x128xbf16, #tpu.memory_space<vmem>>, vector<128x128xbf16>
    %cst = arith.constant dense<0.000000e+00> : vector<8x128xf32>
    %5 = tpu.matmul %3, %4, %cst {dimension_numbers = #tpu.dot_dimension_numbers<[1], [0], [0], [1], [0, 0, 1, 1], [], []>} : vector<8x128xbf16>, vector<128x128xbf16>, vector<8x128xf32> -> vector<8x128xf32>
    %c0_4 = arith.constant 0 : index
    %c0_5 = arith.constant 0 : index
    %6 = vector.load %arg6[%c0_4, %c0_5] : memref<1x128xf32, #tpu.memory_space<vmem>>, vector<1x128xf32>
    %7 = vector.broadcast %6 : vector<1x128xf32> to vector<8x128xf32>
    %8 = arith.addf %5, %7 : vector<8x128xf32>
    %c128_i32 = arith.constant 128 : i32
    %9 = arith.muli %arg1, %c128_i32 : i32
    %10 = tpu.assume_multiple %9, 128 : i32
    %c0_6 = arith.constant 0 : index
    %11 = arith.index_cast %10 : i32 to index
    %12 = vector.load %arg2[%c0_6, %11] : memref<8x128xf32, #tpu.memory_space<vmem>>, vector<8x128xf32>
    %13 = arith.addf %12, %8 : vector<8x128xf32>
    %c0_7 = arith.constant 0 : index
    %c0_8 = arith.constant 0 : index
    %14 = vector.load %arg7[%c0_7, %c0_8] : memref<8x128xf32, #tpu.memory_space<vmem>>, vector<8x128xf32>
    tpu.vector_store %arg7[%c0_7, %c0_8], %13 {strides = array<i32>} : memref<8x128xf32, #tpu.memory_space<vmem>>, vector<8x128xf32>,
    return
  }
  func.func @transform_0(%arg0: i32, %arg1: i32) -> (i32, i32) {
    %c0_i32 = arith.constant 0 : i32
    %c0_i32_0 = arith.constant 0 : i32
    return %arg0, %c0_i32 : i32, i32
  }
  func.func @transform_1(%arg0: i32, %arg1: i32) -> (i32, i32) {
    %c0_i32 = arith.constant 0 : i32
    %c0_i32_0 = arith.constant 0 : i32
    %c0_i32_1 = arith.constant 0 : i32
    return %c0_i32, %c0_i32_0 : i32, i32
  }
  func.func @transform_2(%arg0: i32, %arg1: i32) -> (i32, i32) {
    %c0_i32 = arith.constant 0 : i32
    %c0_i32_0 = arith.constant 0 : i32
    %c0_i32_1 = arith.constant 0 : i32
    return %c0_i32, %c0_i32_0 : i32, i32
  }
  func.func @transform_3(%arg0: i32, %arg1: i32) -> (i32, i32) {
    %c0_i32 = arith.constant 0 : i32
    %c0_i32_0 = arith.constant 0 : i32
    %c0_i32_1 = arith.constant 0 : i32
    return %c0_i32, %c0_i32_0 : i32, i32
  }
  func.func @transform_4(%arg0: i32, %arg1: i32) -> (i32, i32) {
    %c0_i32 = arith.constant 0 : i32
    %c0_i32_0 = arith.constant 0 : i32
    %c0_i32_1 = arith.constant 0 : i32
    return %c0_i32, %c0_i32_0 : i32, i32
  }
  func.func @transform_5(%arg0: i32, %arg1: i32) -> (i32, i32) {
    %c0_i32 = arith.constant 0 : i32
    return %arg0, %arg1 : i32, i32
  }
}

</mosaic_0001>

<bundles_post_ra>
// kernel: tpu_custom_call.1
= control target key start
LH: loop header
LB: loop body
LE: loop exit
PB: predicated region body
PF: predicated region fallthrough
CT: control target
= control target key end

     0   :  { %s1042_s0 = inlined_call_operand.hbm [shape: f32[16,128], index: 0, kind: input, shape index: {}]   ;;  %s1043_s1 = inlined_call_operand.vmem [shape: f32[1,128], index: 1, kind: input, shape index: {}]   ;;  %s1044_s2 = inlined_call_operand.vmem [shape: f32[1,128], index: 2, kind: input, shape index: {}]   ;;  %s1045_s3 = inlined_call_operand.hbm [shape: bf16[128,128], index: 3, kind: input, shape index: {}]   ;;  %s1046_s4 = inlined_call_operand.vmem [shape: f32[1,128], index: 4, kind: input, shape index: {}]   ;;  %s1047_s5 = inlined_call_operand.hbm [shape: f32[16,128], index: 5, kind: output, shape index: {}]  }
   0x1   :  { %1050 = sst [smem:[#allocation13_spill]] %s1045_s3 }
   0x2   :  { %10 = vsyncpa [#allocation4], 0 }
   0x3   :  { %12 = vsyncpa [#allocation4 + $0x1], 0 }
   0x4   :  { %13 = vsyncpa [#allocation7], 0 }
   0x5   :  { %14 = vsyncpa [#allocation5], 0 }
   0x6   :  { %16 = vsyncpa [#allocation5 + $0x1], 0  ;;  %s850_s18 = smov 0   ;;  %s852_s19 = smov 0  }
   0x7   :  { %s854_s20 = smov 0   ;;  %s856_s21 = smov 0  }
   0x8   :  { %s858_s22 = smov 0   ;;  %s860_s23 = smov 0  }
   0x9 LB: > { %s531_s24 = sadd.s32 4294967295, %s811_s23   ;;  %s532_s25 = sadd.s32 4294967294, %s811_s23   ;;  %s811_s23 = sphi %s860_s23, %s22_s23   ;;  %s807_s22 = sphi %s858_s22, %s1070_s22   ;;  %s803_s21 = sphi %s856_s21, %s1069_s21   ;;  %s799_s20 = sphi %s854_s20, %s1068_s20   ;;  %s795_s19 = sphi %s852_s19, %s1067_s19   ;;  %s791_s18 = sphi %s850_s18, %s1066_s18  }
   0xa   : > { %p54_p0 = scmp.ne.s32.totalorder %s795_s19, %s791_s18  ;;  %p884_p1 = scmp.eq.s32.totalorder %s531_s24, 0 }
   0xb   : > { %p888_p2 = scmp.eq.s32.totalorder %s531_s24, 1  ;;  %p170_p3 = scmp.eq.s32.totalorder %s532_s25, 1 }
   0xc   : > { %p894_p4 = por %p884_p1, %p54_p0  ;;  %p533_p5 = scmp.ge.s32.totalorder %s811_s23, 1 }
   0xd   : > { %p899_p6 = por %p170_p3, %p54_p0  ;;  %p177_p7 = scmp.lt.s32.totalorder %s811_s23, 3 }
   0xe   : > { %s1053_s28 = scalar_select %p894_p4, 1, 0 }
   0xf   : > { %s1054_s29 = scalar_select %p899_p6, 1, 0 }
  0x10   : > { %p904_p8 = pnand %p533_p5, %p177_p7  ;;  %s813_s6 = smov [#allocation6]  }
  0x11   : > { %s195_s7 = sshll.u32 %s813_s6, 4  ;;  %s34_s9 = sadd.s32 1, %s807_s22  ;;  %s196_s7 = int_to_ptr.vmem [resolvable:$true] %s195_s7 }
  0x12   : > { %p594_p9 = pneg %p904_p8  ;;  %s684_s10 = scalar_lea.vmem %s196_s7, 1024 }
  0x13   : > { %p685_p13 = scmp.ne.s32.totalorder %s196_s7, %s684_s10  ;;  %p692_p5 = scmp.lt.s32.totalorder %s196_s7, %s196_s7 }
  0x14   : > { %p913_p11 = pnand %p594_p9, %p884_p1  ;;  %p693_p7 = scmp.lt.s32.totalorder %s684_s10, %s684_s10 }
  0x16   : > { %p675_p12 = pneg %p913_p11  ;;  %p694_p6 = por %p693_p7, %p692_p5 }
  0x18   : > { %p687_p0 = pnand %p685_p13, %p675_p12 }
  0x1a   : > { %p688_p3 = pneg %p687_p0 }
  0x1c   : > { %p695_p4 = pnand %p694_p6, %p688_p3 }
  0x1e   : > { %698 = shalt.err (!%p695_p4)
}
  0x1f   : > { %s814_s11 = smov 64   ;;  %s815_s12 = smov 4  }
  0x20   : > { %s1057_s3 = sld [smem:[#allocation13_spill]]  ;;  %p36_p6 = scmp.ge.s32.totalorder %s34_s9, 2 }
  0x21   : > { %s41_s15 = sadd.s32 1, %s799_s20  ;;  %p48_p4 = scmp.ne.s32.totalorder %s799_s20, %s795_s19 }
  0x22   : > { %p49_p9 = scmp.eq.s32.totalorder %s811_s23, 0  ;;  %s1072_s9 = smov (%p36_p6, %s34_s9), 0 }
  0x23   : > { %1058 = sst [smem:[#allocation12_spill]] %s1072_s9  ;;  %p937_p13 = por %p888_p2, %p48_p4 }
  0x24   : > { %p931_p12 = por %p49_p9, %p48_p4  ;;  %s38_s24 = ssub.s32 %s807_s22, %s1072_s9 }
  0x25   : > { %p607_p0 = scmp.lt.s32.totalorder %s811_s23, 2  ;;  %s212_s25 = sand.u32 1, %s799_s20  }
  0x26   : > { %597 = dma.hbm_to_vmem [thread:$0]  (!%p913_p11), %s1057_s3, 1024, %s196_s7, [#allocation7], %s814_s11, %s814_s11, %s815_s12  }
  0x27   : > { %p39_p11 = scmp.eq.s32.totalorder %s38_s24, 0  ;;  %s536_s6 = sshll.u32 %s212_s25, 3 }
  0x28   : > { %s537_s8 = sshll.u32 %s807_s22, 7  ;;  %s216_s13 = scalar_lea.vmem [#allocation3], %s536_s6 }
  0x29   : > { %s946_s7 = scalar_select %p39_p11, %s799_s20, %s41_s15  }
  0x2a   : > { %s221_s12 = scalar_lea.hbm %s1042_s0, %s537_s8  ;;  %s223_s14 = sshll.u32 %s216_s13, 4  ;;  %s224_s14 = int_to_ptr.vmem [resolvable:$true] %s223_s14 }
  0x2b   : > { %p954_p2 = pnand %p607_p0, %p931_p12  ;;  %s213_s3 = scalar_lea.sflag [#allocation4], %s212_s25 }
  0x2c   : > { %s712_s24 = scalar_lea.vmem %s224_s14, 128  ;;  %s816_s15 = smov [#allocation3]  }
  0x2d   : > { %p701_p3 = pneg %p954_p2  ;;  %p713_p5 = scmp.ne.s32.totalorder %s224_s14, %s712_s24 }
  0x2e   : > { %s717_s9 = sshll.u32 %s816_s15, 4  ;;  %s718_s9 = int_to_ptr.vmem [resolvable:$false] %s717_s9 }
  0x2f   : > { %p715_p7 = pnand %p713_p5, %p701_p3  ;;  %s719_s8 = scalar_lea.vmem %s718_s9, 256 }
  0x30   : > { %p720_p4 = scmp.lt.s32.totalorder %s224_s14, %s718_s9  ;;  %p721_p9 = scmp.lt.s32.totalorder %s719_s8, %s712_s24 }
  0x31   : > { %p716_p6 = pneg %p715_p7 }
  0x32   : > { %p722_p11 = por %p721_p9, %p720_p4 }
  0x34   : > { %p723_p10 = pnand %p722_p11, %p716_p6 }
  0x36   : > { %726 = shalt.err (!%p723_p10)
}
  0x37   : > { %601 = dma.hbm_to_vmem [thread:$0]  (!%p954_p2), %s221_s12, 128, %s224_s14, %s213_s3  }
  0x38   : > { %232 = sbr.rel (%p904_p8) target bundleno = 456 (0x1c8), region = 40  ;;  %s965_s16 = sand.u32 (!%p904_p8), 1, %s795_s19  }
  0x39   : > { %s539_s25 = sshll.u32 (!%p904_p8), %s965_s16, 3  ;;  %s235_s6 = scalar_lea.sflag (!%p904_p8), [#allocation4], %s965_s16 }
  0x3a   : > { %s238_s9 = scalar_lea.vmem (!%p904_p8), [#allocation3], %s539_s25  ;;  %p1062_p12 = scmp.ne.s32.totalorder (!%p904_p8), %s1053_s28, 0 }
  0x3d   : > { %778 = dma.done.wait (%p1062_p12), %s235_s6, 128  }
  0x3e   : > { %780 = vsyncadd (%p1062_p12), %s235_s6, 4294967168 }
  0x3f   : > { %782 = dma.done.wait (%p884_p1), [#allocation7], 1024  }
  0x40   : > { %784 = vsyncadd (%p884_p1), [#allocation7], 4294966272  ;;  %v274_v0 = vld [vmem:[%s238_s9] sm:$0xff]  ;;  %v817_v3 = vmov 0.0   ;;  %v665_v5 = vld [vmem:[#allocation6 + $0x28] sm:$0xff]   ;;  %vm818_vm0 = vmmov 0  }
  0x41   : > { %275 = vadd.xlane.f32.xlu0 %v274_v0  ;;  %v277_v1 = vmul.f32 %v274_v0, %v274_v0  ;;  %v663_v2 = vld [vmem:[#allocation6 + $0x38] sm:$0xff]   ;;  %566 = vmatprep.subr.bf16.mxu0 %v817_v3  ;;  %v664_v4 = vld [vmem:[#allocation6 + $0x30] sm:$0xff]   ;;  %v666_v6 = vld [vmem:[#allocation6 + $0x20] sm:$0xff]   ;;  %s554_s12 = sshll.u32 %s803_s21, 7  ;;  %s268_s13 = scalar_lea.vmem [#allocation8], %s539_s25 }
  0x42   : > { %567 = vmatpush3.bf16.msra.mxu0 %v663_v2  ;;  %v667_v7 = vld [vmem:[#allocation6 + $0x18] sm:$0xff]   ;;  %v668_v8 = vld [vmem:[#allocation6 + $0x10] sm:$0xff]   ;;  %v669_v9 = vld [vmem:[#allocation6 + $0x8] sm:$0xff]   ;;  %582 = vmatprep.mubr.msk.bf16.mxu0 %vm818_vm0, %v817_v3  ;;  %s441_s14 = sshll.u32 %s268_s13, 4  ;;  %s994_s15 = scalar_lea.hbm %s1047_s5, %s554_s12  ;;  %s996_s14 = int_to_ptr.vmem [resolvable:$true] %s441_s14 }
  0x43   : > { %568 = vmatprep.subr.bf16.mxu0 %v817_v3  ;;  %v670_v10 = vld [vmem:[#allocation6] sm:$0xff]   ;;  %v542_v21 = vld [vmem:[%s1043_s1] ss:$0 sm:$0xff]  ;;  %s427_s21 = scalar_lea.sflag [#allocation5], %s965_s16  ;;  %s727_s8 = scalar_lea.vmem %s996_s14, 128 }
  0x44   : > { %v543_v23 = vld [vmem:[%s1044_s2] ss:$0 sm:$0xff]  ;;  %p728_p1 = scmp.ne.s32.totalorder %s996_s14, %s727_s8  ;;  %s819_s25 = smov [#allocation8]  }
  0x45   : > { %278 = vadd.xlane.f32.xlu0 %v277_v1  ;;  %v544_v28 = vld [vmem:[%s1046_s4] ss:$0 sm:$0xff]  ;;  %s731_s6 = sshll.u32 %s819_s25, 4  ;;  %s732_s6 = int_to_ptr.vmem [resolvable:$false] %s731_s6 }
  0x46   : > { %569 = vmatpush3.bf16.msra.mxu0 %v664_v4  ;;  %p729_p8 = pnand %p728_p1, %p937_p13  ;;  %s733_s9 = scalar_lea.vmem %s732_s6, 256 }
  0x47   : > { %570 = vmatprep.subr.bf16.mxu0 %v817_v3  ;;  %p734_p0 = scmp.lt.s32.totalorder %s996_s14, %s732_s6  ;;  %p735_p2 = scmp.lt.s32.totalorder %s733_s9, %s727_s8 }
  0x48   : > { %p730_p10 = pneg %p729_p8 }
  0x49   : > { %p736_p3 = por %p735_p2, %p734_p0 }
  0x4a   : > { %571 = vmatpush3.bf16.msra.mxu0 %v665_v5 }
  0x4b   : > { %572 = vmatprep.subr.bf16.mxu0 %v817_v3  ;;  %p737_p5 = pnand %p736_p3, %p730_p10 }
  0x4e   : > { %573 = vmatpush3.bf16.msra.mxu0 %v666_v6 }
  0x4f   : > { %574 = vmatprep.subr.bf16.mxu0 %v817_v3 }
  0x52   : > { %575 = vmatpush3.bf16.msra.mxu0 %v667_v7 }
  0x53   : > { %576 = vmatprep.subr.bf16.mxu0 %v817_v3 }
  0x56   : > { %577 = vmatpush3.bf16.msra.mxu0 %v668_v8 }
  0x57   : > { %578 = vmatprep.subr.bf16.mxu0 %v817_v3 }
  0x5a   : > { %579 = vmatpush3.bf16.msra.mxu0 %v669_v9 }
  0x5b   : > { %580 = vmatprep.subr.bf16.mxu0 %v817_v3 }
  0x5e   : > { %581 = vmatpush3.bf16.msra.mxu0 %v670_v10 }
  0xca   : > { %v276_v11 = vpop.xlane.xlu0 %275 }
  0xcb   : > { %v280_v12 = vmul.f32 0.03125, %v276_v11 }
  0xcd   : > { %v282_v14 = vmul.f32 %v280_v12, %v280_v12  ;;  %v285_v19 = vsub.f32 %v274_v0, %v280_v12 }
  0xce   : > { %v279_v13 = vpop.xlane.xlu0 %278 }
  0xcf   : > { %v281_v15 = vmul.f32 0.03125, %v279_v13 }
  0xd1   : > { %v283_v16 = vsub.f32 %v281_v15, %v282_v14 }
  0xd3   : > { %v284_v17 = vmax.f32 %v283_v16, 0.0 }
  0xd5   : > { %v286_v18 = vadd.f32 1e-05, %v284_v17 }
  0xd7   : > { %671 = vrsqrt.f32 %v286_v18 }
  0xe4   : > { %v672_v20 = vpop.eup %671 }
  0xe5   : > { %v288_v22 = vmul.f32 %v672_v20, %v285_v19 }
  0xe7   : > { %v296_v24 = vmul.f32 %v542_v21, %v288_v22 }
  0xe9   : > { %v304_v25 = vadd.f32 %v543_v23, %v296_v24 }
  0xeb   : > { %v305_v26 = vpack.c.bf16 %v304_v25, %v304_v25 }
  0xed   : > { %306 = vst [vmem:[#allocation2] sm:$0xf] %v305_v26 }
  0xf4   : > { %v307_v27 = vld [vmem:[#allocation2] sm:$0xf] }
  0xf5   : > { %583 = vmatmul.mubr.bf16.vlgmr.msra.gmra.mxu0 %v307_v27 }
 0x1b5   : > { %v413_v29 = vpop.f32.mrf.mxu0 }
 0x1b6   : > { %v414_v30 = vadd.f32 %v544_v28, %v413_v29 }
 0x1b7   : > { %v584_v31 = vpop.f32.mrf.mxu0 }
 0x1b8   : > { %v424_v32 = vadd.f32 %v414_v30, %v274_v0 }
 0x1b9   : > { %v416_v33 = vpop.f32.mrf.mxu0 }
 0x1ba   : > { %425 = vst [vmem:[%s268_s13] sm:$0xff] %v424_v32 }
 0x1bb   : > { %v585_v34 = vpop.f32.mrf.mxu0 }
 0x1bc   : > { %740 = shalt.err (!%p737_p5)
}
 0x1bd   : > { %s741_s3 = scalar_lea.hbm %s994_s15, 128  ;;  %s745_s28 = scalar_lea.hbm %s1047_s5, 256 }
 0x1be   : > { %p742_p7 = scmp.ne.s32.totalorder %s994_s15, %s741_s3  ;;  %p746_p9 = scmp.lt.s32.totalorder %s994_s15, %s1047_s5 }
 0x1bf   : > { %p747_p11 = scmp.lt.s32.totalorder %s745_s28, %s741_s3 }
 0x1c0   : > { %p743_p6 = pnand %p742_p7, %p937_p13 }
 0x1c1   : > { %p748_p12 = por %p747_p11, %p746_p9 }
 0x1c2   : > { %p744_p4 = pneg %p743_p6 }
 0x1c4   : > { %p749_p1 = pnand %p748_p12, %p744_p4 }
 0x1c6   : > { %752 = shalt.err (!%p749_p1)
}
 0x1c7   : > { %592 = dma.vmem_to_hbm [thread:$0]  (%p937_p13), %s996_s14, 128, %s994_s15, %s427_s21  }
 0x1c8 PF: > { %s453_s11 = sand.u32 1, %s791_s18   ;;  %p1063_p8 = scmp.ne.s32.totalorder %s1054_s29, 0 }
 0x1c9   : > { %p1064_p10 = scmp.ge.s32.totalorder %s811_s23, 2  ;;  %s454_s12 = scalar_lea.sflag [#allocation5], %s453_s11 }
 0x1cb   : > { %p603_p0 = pnand %p1064_p10, %p1063_p8 }
 0x1cd   : > { %p604_p2 = pneg %p603_p0 }
 0x1cf   : > { %786 = dma.done.wait (%p604_p2), %s454_s12, 128  }
 0x1d0   : > { %788 = vsyncadd (%p604_p2), %s454_s12, 4294967168  ;;  %s22_s23 = sadd.s32 1, %s811_s23   ;;  %s1065_s17 = sld [smem:[#allocation12_spill]] }
 0x1d1   : > { %p19_p3 = scmp.ge.s32.totalorder %s22_s23, 4   ;;  %s1066_s18 = smov %s795_s19 }
 0x1d2   : > { %s1067_s19 = smov %s799_s20  ;;  %s1068_s20 = smov %s946_s7 }
 0x1d3   : > { %s1069_s21 = smov %s807_s22  ;;  %21 = sbr.rel (!%p19_p3) target bundleno = 9 (0x9), region = 94 }
 0x1d6   : > { %s1070_s22 = smov %s1065_s17 }
 0x1d8   :  { %459 = vsyncpa [#allocation4], 1 }
 0x1d9   :  { %461 = vsyncpa [#allocation4 + $0x1], 1 }
 0x1da   :  { %462 = vsyncpa [#allocation7], 1 }
 0x1db   :  { %463 = vsyncpa [#allocation5], 1 }
 0x1dc   :  { %465 = vsyncpa [#allocation5 + $0x1], 1 }

</bundles_post_ra>
